<compile_context>
chip_gen: v7x
topology: tpu7x:2x2x1
jax: 0.10.0
libtpu: 0.0.40
codegen_flags: <defaults>
</compile_context>

<pallas_src>
import jax
import jax.numpy as jnp
from jax.experimental import pallas as pl
from jax.experimental.pallas import tpu as pltpu

HIDDEN = 128
HEAD_PAD = 128   # lane-dense fused-head width (lanes 0..2 hold a, alpha, beta)
TB = 256         # batch tile


def _pinn_kernel(x_ref, w1_ref, b1_ref, w2_ref, b2_ref, wh_ref, bh_ref, out_ref):
    # fc1: K=1 -> rank-1 outer product on the VPU.
    x = x_ref[...]                                              # (TB, 1) f32
    h1 = jnp.tanh(x * w1_ref[...] + b1_ref[...])                # (TB, HIDDEN) f32

    # fc2: the only real matmul. bf16 operands, f32 accumulation.
    h2 = jnp.dot(h1.astype(jnp.bfloat16), w2_ref[...],
                 preferred_element_type=jnp.float32) + b2_ref[...]
    h2 = jnp.tanh(h2)                                           # (TB, HIDDEN) f32

    # Fused heads: one (TB,128)@(128,128) matmul -> lane-dense (TB,128) slab.
    out_ref[...] = (jnp.dot(h2.astype(jnp.bfloat16), wh_ref[...],
                            preferred_element_type=jnp.float32)
                    + bh_ref[...]).astype(out_ref.dtype)


def pinn_forward(x, params, tb=TB):
    """x: (N, 1) float32.  Returns (a_x, alpha_x, beta_x), each (N, 1)."""
    N = x.shape[0]
    n_blocks = pl.cdiv(N, tb)
    Np = n_blocks * tb
    if Np != N:
        x = jnp.pad(x, ((0, Np - N), (0, 0)))

    # Fuse the three 128->1 heads into one lane-padded 128->128 head.
    wh = jnp.concatenate([params["wa"], params["walpha"], params["wbeta"]], axis=1)
    wh = jnp.pad(wh, ((0, 0), (0, HEAD_PAD - wh.shape[1])))
    bh = jnp.concatenate([params["ba"], params["balpha"], params["bbeta"]], axis=1)
    bh = jnp.pad(bh, ((0, 0), (0, HEAD_PAD - bh.shape[1])))

    w2_bf16 = params["w2"].astype(jnp.bfloat16)
    wh_bf16 = wh.astype(jnp.bfloat16)

    in_specs = [
        pl.BlockSpec((tb, 1), lambda i: (i, 0)),             # x (batch-tiled)
        pl.BlockSpec((1, HIDDEN), lambda i: (0, 0)),         # w1
        pl.BlockSpec((1, HIDDEN), lambda i: (0, 0)),         # b1
        pl.BlockSpec((HIDDEN, HIDDEN), lambda i: (0, 0)),    # w2 (bf16)
        pl.BlockSpec((1, HIDDEN), lambda i: (0, 0)),         # b2
        pl.BlockSpec((HIDDEN, HEAD_PAD), lambda i: (0, 0)),  # fused head W (bf16)
        pl.BlockSpec((1, HEAD_PAD), lambda i: (0, 0)),       # fused head b
    ]
    out_spec = pl.BlockSpec((tb, HEAD_PAD), lambda i: (i, 0))

    fn = pl.pallas_call(
        _pinn_kernel,
        grid_spec=pltpu.PrefetchScalarGridSpec(
            num_scalar_prefetch=0,
            grid=(n_blocks,),
            in_specs=in_specs,
            out_specs=out_spec,
        ),
        out_shape=jax.ShapeDtypeStruct((Np, HEAD_PAD), jnp.float32),
        compiler_params=pltpu.CompilerParams(
            dimension_semantics=("parallel",)),   # independent batch tiles
    )

    out = fn(x, params["w1"], params["b1"], w2_bf16, params["b2"], wh_bf16, bh)
    return out[:N, 0:1], out[:N, 1:2], out[:N, 2:3]


def init_params(key):
    """Deterministic init; weights stored as (in_features, out_features)."""
    keys = jax.random.split(key, 10)

    def unif(k, shape, fan_in):
        bound = 1.0 / jnp.sqrt(float(fan_in))
        return jax.random.uniform(k, shape, jnp.float32, -bound, bound)

    return {
        "w1": unif(keys[0], (1, HIDDEN), 1),
        "b1": unif(keys[1], (1, HIDDEN), 1),
        "w2": unif(keys[2], (HIDDEN, HIDDEN), HIDDEN),
        "b2": unif(keys[3], (1, HIDDEN), HIDDEN),
        "wa": unif(keys[4], (HIDDEN, 1), HIDDEN),
        "ba": unif(keys[5], (1, 1), HIDDEN),
        "walpha": unif(keys[6], (HIDDEN, 1), HIDDEN),
        "balpha": unif(keys[7], (1, 1), HIDDEN),
        "wbeta": unif(keys[8], (HIDDEN, 1), HIDDEN),
        "bbeta": unif(keys[9], (1, 1), HIDDEN),
    }


def pinn_forward_ref(x, p):
    """Pure-f32 reference matching the PyTorch forward."""
    h1 = jnp.tanh(x @ p["w1"] + p["b1"])
    h2 = jnp.tanh(h1 @ p["w2"] + p["b2"])
    return (h2 @ p["wa"] + p["ba"],
            h2 @ p["walpha"] + p["balpha"],
            h2 @ p["wbeta"] + p["bbeta"])


if __name__ == "__main__":
    key = jax.random.PRNGKey(0)
    pkey, xkey = jax.random.split(key)
    params = init_params(pkey)

    N = 300  # intentionally not a tile multiple -> exercises the padding path
    x = jax.random.uniform(xkey, (N, 1), jnp.float32)

    a_x, alpha_x, beta_x = pinn_forward(x, params)
    jax.block_until_ready((a_x, alpha_x, beta_x))

    a_r, al_r, b_r = pinn_forward_ref(x, params)
    assert a_x.shape == (N, 1) and alpha_x.shape == (N, 1) and beta_x.shape == (N, 1)
    # bf16 MXU operands (f32 accumulation) vs f32 reference -> ~1e-2 tolerance.
    assert jnp.allclose(a_x, a_r, atol=2e-2, rtol=2e-2)
    assert jnp.allclose(alpha_x, al_r, atol=2e-2, rtol=2e-2)
    assert jnp.allclose(beta_x, b_r, atol=2e-2, rtol=2e-2)

    print("KERNEL_OK")
</pallas_src>

<mosaic_0001>
module attributes {stable_mosaic.version = 11 : i64} {
  func.func @_pinn_kernel(%arg0: i32, %arg1: memref<256x1xf32, #tpu.memory_space<vmem>>, %arg2: memref<1x128xf32, #tpu.memory_space<vmem>>, %arg3: memref<1x128xf32, #tpu.memory_space<vmem>>, %arg4: memref<128x128xbf16, #tpu.memory_space<vmem>>, %arg5: memref<1x128xf32, #tpu.memory_space<vmem>>, %arg6: memref<128x128xbf16, #tpu.memory_space<vmem>>, %arg7: memref<1x128xf32, #tpu.memory_space<vmem>>, %arg8: memref<256x128xf32, #tpu.memory_space<vmem>>) attributes {dimension_semantics = [#tpu.dimension_semantics<parallel>], iteration_bounds = array<i64: 2>, scalar_prefetch = 0 : i64, scratch_operands = 0 : i64, tpu.core_type = #tpu.core_type<tc>, window_params = [{transform_indices = @transform_0, window_bounds = array<i64: 256, 1>}, {pipeline_mode = #tpu.pipeline_mode<synchronous>, transform_indices = @transform_1, window_bounds = array<i64: 1, 128>}, {pipeline_mode = #tpu.pipeline_mode<synchronous>, transform_indices = @transform_2, window_bounds = array<i64: 1, 128>}, {pipeline_mode = #tpu.pipeline_mode<synchronous>, transform_indices = @transform_3, window_bounds = array<i64: 128, 128>}, {pipeline_mode = #tpu.pipeline_mode<synchronous>, transform_indices = @transform_4, window_bounds = array<i64: 1, 128>}, {pipeline_mode = #tpu.pipeline_mode<synchronous>, transform_indices = @transform_5, window_bounds = array<i64: 128, 128>}, {pipeline_mode = #tpu.pipeline_mode<synchronous>, transform_indices = @transform_6, window_bounds = array<i64: 1, 128>}, {transform_indices = @transform_7, window_bounds = array<i64: 256, 128>}]} {
    %c0 = arith.constant 0 : index
    %c0_0 = arith.constant 0 : index
    %0 = vector.load %arg1[%c0, %c0_0] : memref<256x1xf32, #tpu.memory_space<vmem>>, vector<256x1xf32>
    %c0_1 = arith.constant 0 : index
    %c0_2 = arith.constant 0 : index
    %1 = vector.load %arg2[%c0_1, %c0_2] : memref<1x128xf32, #tpu.memory_space<vmem>>, vector<1x128xf32>
    %2 = vector.broadcast %0 : vector<256x1xf32> to vector<256x128xf32>
    %3 = vector.broadcast %1 : vector<1x128xf32> to vector<256x128xf32>
    %4 = arith.mulf %2, %3 : vector<256x128xf32>
    %c0_3 = arith.constant 0 : index
    %c0_4 = arith.constant 0 : index
    %5 = vector.load %arg3[%c0_3, %c0_4] : memref<1x128xf32, #tpu.memory_space<vmem>>, vector<1x128xf32>
    %6 = vector.broadcast %5 : vector<1x128xf32> to vector<256x128xf32>
    %7 = arith.addf %4, %6 : vector<256x128xf32>
    %8 = math.tanh %7 : vector<256x128xf32>
    %9 = arith.truncf %8 : vector<256x128xf32> to vector<256x128xbf16>
    %c0_5 = arith.constant 0 : index
    %c0_6 = arith.constant 0 : index
    %10 = vector.load %arg4[%c0_5, %c0_6] : memref<128x128xbf16, #tpu.memory_space<vmem>>, vector<128x128xbf16>
    %cst = arith.constant dense<0.000000e+00> : vector<256x128xf32>
    %11 = tpu.matmul %9, %10, %cst {dimension_numbers = #tpu.dot_dimension_numbers<[1], [0], [0], [1], [0, 0, 1, 1], [], []>} : vector<256x128xbf16>, vector<128x128xbf16>, vector<256x128xf32> -> vector<256x128xf32>
    %c0_7 = arith.constant 0 : index
    %c0_8 = arith.constant 0 : index
    %12 = vector.load %arg5[%c0_7, %c0_8] : memref<1x128xf32, #tpu.memory_space<vmem>>, vector<1x128xf32>
    %13 = vector.broadcast %12 : vector<1x128xf32> to vector<256x128xf32>
    %14 = arith.addf %11, %13 : vector<256x128xf32>
    %15 = math.tanh %14 : vector<256x128xf32>
    %16 = arith.truncf %15 : vector<256x128xf32> to vector<256x128xbf16>
    %c0_9 = arith.constant 0 : index
    %c0_10 = arith.constant 0 : index
    %17 = vector.load %arg6[%c0_9, %c0_10] : memref<128x128xbf16, #tpu.memory_space<vmem>>, vector<128x128xbf16>
    %cst_11 = arith.constant dense<0.000000e+00> : vector<256x128xf32>
    %18 = tpu.matmul %16, %17, %cst_11 {dimension_numbers = #tpu.dot_dimension_numbers<[1], [0], [0], [1], [0, 0, 1, 1], [], []>} : vector<256x128xbf16>, vector<128x128xbf16>, vector<256x128xf32> -> vector<256x128xf32>
    %c0_12 = arith.constant 0 : index
    %c0_13 = arith.constant 0 : index
    %19 = vector.load %arg7[%c0_12, %c0_13] : memref<1x128xf32, #tpu.memory_space<vmem>>, vector<1x128xf32>
    %20 = vector.broadcast %19 : vector<1x128xf32> to vector<256x128xf32>
    %21 = arith.addf %18, %20 : vector<256x128xf32>
    %c0_14 = arith.constant 0 : index
    %c0_15 = arith.constant 0 : index
    %22 = vector.load %arg8[%c0_14, %c0_15] : memref<256x128xf32, #tpu.memory_space<vmem>>, vector<256x128xf32>
    tpu.vector_store %arg8[%c0_14, %c0_15], %21 {strides = array<i32>} : memref<256x128xf32, #tpu.memory_space<vmem>>, vector<256x128xf32>,
    return
  }
  func.func @transform_0(%arg0: i32) -> (i32, i32) {
    %c0_i32 = arith.constant 0 : i32
    %c0_i32_0 = arith.constant 0 : i32
    return %arg0, %c0_i32 : i32, i32
  }
  func.func @transform_1(%arg0: i32) -> (i32, i32) {
    %c0_i32 = arith.constant 0 : i32
    %c0_i32_0 = arith.constant 0 : i32
    %c0_i32_1 = arith.constant 0 : i32
    return %c0_i32, %c0_i32_0 : i32, i32
  }
  func.func @transform_2(%arg0: i32) -> (i32, i32) {
    %c0_i32 = arith.constant 0 : i32
    %c0_i32_0 = arith.constant 0 : i32
    %c0_i32_1 = arith.constant 0 : i32
    return %c0_i32, %c0_i32_0 : i32, i32
  }
  func.func @transform_3(%arg0: i32) -> (i32, i32) {
    %c0_i32 = arith.constant 0 : i32
    %c0_i32_0 = arith.constant 0 : i32
    %c0_i32_1 = arith.constant 0 : i32
    return %c0_i32, %c0_i32_0 : i32, i32
  }
  func.func @transform_4(%arg0: i32) -> (i32, i32) {
    %c0_i32 = arith.constant 0 : i32
    %c0_i32_0 = arith.constant 0 : i32
    %c0_i32_1 = arith.constant 0 : i32
    return %c0_i32, %c0_i32_0 : i32, i32
  }
  func.func @transform_5(%arg0: i32) -> (i32, i32) {
    %c0_i32 = arith.constant 0 : i32
    %c0_i32_0 = arith.constant 0 : i32
    %c0_i32_1 = arith.constant 0 : i32
    return %c0_i32, %c0_i32_0 : i32, i32
  }
  func.func @transform_6(%arg0: i32) -> (i32, i32) {
    %c0_i32 = arith.constant 0 : i32
    %c0_i32_0 = arith.constant 0 : i32
    %c0_i32_1 = arith.constant 0 : i32
    return %c0_i32, %c0_i32_0 : i32, i32
  }
  func.func @transform_7(%arg0: i32) -> (i32, i32) {
    %c0_i32 = arith.constant 0 : i32
    %c0_i32_0 = arith.constant 0 : i32
    return %arg0, %c0_i32 : i32, i32
  }
}

</mosaic_0001>

<bundles_post_ra>
// kernel: tpu_custom_call.1
= control target key start
LH: loop header
LB: loop body
LE: loop exit
PB: predicated region body
PF: predicated region fallthrough
CT: control target
= control target key end

     0   :  { %12 = vsyncpa [#allocation3], 0  ;;  %s2063_s0 = inlined_call_operand.vmem [shape: f32[512,1], index: 0, kind: input, shape index: {}]   ;;  %s2064_s1 = inlined_call_operand.vmem [shape: f32[1,128], index: 1, kind: input, shape index: {}]   ;;  %s2065_s2 = inlined_call_operand.vmem [shape: f32[1,128], index: 2, kind: input, shape index: {}]   ;;  %s2066_s3 = inlined_call_operand.vmem [shape: bf16[128,128], index: 3, kind: input, shape index: {}]   ;;  %s2067_s4 = inlined_call_operand.vmem [shape: f32[1,128], index: 4, kind: input, shape index: {}]   ;;  %s2068_s5 = inlined_call_operand.vmem [shape: bf16[128,128], index: 5, kind: input, shape index: {}]   ;;  %s2069_s6 = inlined_call_operand.vmem [shape: f32[1,128], index: 6, kind: input, shape index: {}]   ;;  %s2070_s7 = inlined_call_operand.hbm [shape: f32[512,128], index: 7, kind: output, shape index: {}]  }
   0x1   :  { %14 = vsyncpa [#allocation3 + $0x1], 0  ;;  %s1692_s24 = smov 0   ;;  %s1694_s25 = smov 0  }
   0x2   :  { %s1696_s26 = smov 0   ;;  %s1698_s27 = smov 0  }
   0x3 LB: > { %s1713_s28 = sadd.s32 4294967295, %s1646_s27   ;;  %s1219_s29 = sadd.s32 4294967294, %s1646_s27   ;;  %s1646_s27 = sphi %s1698_s27, %s2076_s27   ;;  %s1642_s26 = sphi %s1696_s26, %s2075_s26   ;;  %s1638_s25 = sphi %s1694_s25, %s2074_s25   ;;  %s1634_s24 = sphi %s1692_s24, %s2073_s24  }
   0x4   : > { %s1717_s30 = sadd.s32 1, %s1646_s27   ;;  %s179_s8 = sadd.s32 1, %s1642_s26 }
   0x5   : > { %s176_s9 = ssub.s32 %s1646_s27, %s1717_s30  ;;  %p189_p0 = scmp.ne.s32.totalorder %s1642_s26, %s1638_s25 }
   0x6   : > { %p177_p1 = scmp.eq.s32.totalorder %s176_s9, 0  ;;  %p190_p2 = scmp.eq.s32.totalorder %s1713_s28, 1 }
   0x7   : > { %p195_p3 = scmp.ne.s32.totalorder %s1638_s25, %s1634_s24  ;;  %p196_p4 = scmp.eq.s32.totalorder %s1219_s29, 1 }
   0x8   : > { %s1728_s10 = scalar_select %p177_p1, %s1642_s26, %s179_s8  }
   0x9   : > { %p1730_p5 = por %p190_p2, %p189_p0  ;;  %p1734_p6 = por %p196_p4, %p195_p3 }
   0xa   : > { %p1222_p7 = scmp.ge.s32.totalorder %s1646_s27, 1  ;;  %p241_p8 = scmp.lt.s32.totalorder %s1646_s27, 3 }
   0xc   : > { %p242_p9 = pnand %p1222_p7, %p241_p8 }
   0xd   : > { %s1224_s13 = sshll.u32 (!%p242_p9), %s1713_s28, 5  ;;  %v1648_v0 = vmov (!%p242_p9), 0   ;;  %v1440_v1 = vld [vmem:[%s2066_s3] sm:$0xff] (!%p242_p9)   ;;  %v1441_v2 = vld [vmem:[%s2066_s3 + $0x8] sm:$0xff] (!%p242_p9)   ;;  %v1442_v3 = vld [vmem:[%s2066_s3 + $0x10] sm:$0xff] (!%p242_p9)   ;;  %s270_s14 = sand.u32 (!%p242_p9), 1, %s1638_s25  }
   0xe   : > { %245 = sbr.rel (%p242_p9) target bundleno = 695 (0x2b7), region = 48  ;;  %1439 = vset.pattern.permute.xlu1 (!%p242_p9), %v1648_v0  ;;  %1438 = vset.pattern.permute.xlu0 (!%p242_p9), %v1648_v0  ;;  %p274_p10 = scmp.lt.s32.totalorder (!%p242_p9), %s1224_s13, 63  ;;  %v1443_v12 = vld [vmem:[%s2066_s3 + $0x18] sm:$0xff] (!%p242_p9)   ;;  %v1444_v13 = vld [vmem:[%s2066_s3 + $0x20] sm:$0xff] (!%p242_p9)   ;;  %v1445_v16 = vld [vmem:[%s2066_s3 + $0x28] sm:$0xff] (!%p242_p9)  }
   0xf   : > { %1300 = vmatprep.subr.bf16.mxu0 (!%p242_p9), %v1440_v1  ;;  %v1446_v19 = vld [vmem:[%s2066_s3 + $0x30] sm:$0xff] (!%p242_p9)   ;;  %v1447_v22 = vld [vmem:[%s2066_s3 + $0x38] sm:$0xff] (!%p242_p9)   ;;  %v1448_v41 = vld [vmem:[%s2068_s5] sm:$0xff] (!%p242_p9)   ;;  %s1223_s15 = sshll.u32 (!%p242_p9), %s270_s14, 8  ;;  %s1251_s19 = sshll.u32 (!%p242_p9), %s1713_s28, 12 }
  0x10   : > { %1301 = vmatpush3.bf16.msra.mxu0 (!%p242_p9), %v1440_v1  ;;  %v1449_v42 = vld [vmem:[%s2068_s5 + $0x8] sm:$0xff] (!%p242_p9)   ;;  %1348 = vmatprep.subr.bf16.mxu1 (!%p242_p9), %v1448_v41  ;;  %v1450_v43 = vld [vmem:[%s2068_s5 + $0x10] sm:$0xff] (!%p242_p9)   ;;  %v1814_v44 = vld [vmem:[%s2064_s1] ss:$0 sm:$0xff] (!%p242_p9)  ;;  %s2012_s29 = scalar_lea.hbm (!%p242_p9), %s2070_s7, %s1251_s19  ;;  %s2022_s28 = scalar_lea.sflag (!%p242_p9), [#allocation3], %s270_s14 }
  0x11   : > { %1302 = vmatprep.subr.bf16.mxu0 (!%p242_p9), %v1441_v2  ;;  %1349 = vmatpush3.bf16.msra.mxu1 (!%p242_p9), %v1448_v41  ;;  %v1819_v45 = vld [vmem:[%s2065_s2] ss:$0 sm:$0xff] (!%p242_p9)  ;;  %s1649_s9 = smov (!%p242_p9), [#allocation2]  }
  0x12   : > { %1350 = vmatprep.subr.bf16.mxu1 (!%p242_p9), %v1449_v42 }
  0x14   : > { %1303 = vmatpush3.bf16.msra.mxu0 (!%p242_p9), %v1441_v2 }
  0x15   : > { %s2078_s13 = smov (!%p274_p10, %s1224_s13), 63  ;;  %1304 = vmatprep.subr.bf16.mxu0 %v1442_v3  ;;  %1351 = vmatpush3.bf16.msra.mxu1 %v1449_v42 }
  0x16   : > { %s1225_s18 = sshll.u32 %s2078_s13, 3  ;;  %1352 = vmatprep.subr.bf16.mxu1 %v1450_v43 }
  0x17   : > { %s1753_s23 = scalar_lea.vmem %s2063_s0, %s1225_s18  ;;  %s1947_s18 = scalar_lea.vmem [#allocation2], %s1223_s15 }
  0x18   : > { %v283_v4 = vld [vmem:[%s1753_s23 + $0x10] sm:$0xff]  ;;  %v281_v5 = vld [vmem:[%s1753_s23] sm:$0xff]  ;;  %v284_v6 = vld [vmem:[%s1753_s23 + $0x18] sm:$0xff]  ;;  %1305 = vmatpush3.bf16.msra.mxu0 %v1442_v3  ;;  %s1157_s20 = sshll.u32 %s1947_s18, 4  ;;  %s2014_s20 = int_to_ptr.vmem [resolvable:$true] %s1157_s20 }
  0x19   : > { %326 = vperm.xlu1 %1439, %v283_v4   ;;  %316 = vperm.xlu0 %1438, %v281_v5   ;;  %v282_v7 = vld [vmem:[%s1753_s23 + $0x8] sm:$0xff]  ;;  %v285_v9 = vld [vmem:[%s1753_s23 + $0x20] sm:$0xff]  ;;  %v288_v10 = vld [vmem:[%s1753_s23 + $0x38] sm:$0xff]  ;;  %s1584_s8 = scalar_lea.vmem %s2014_s20, 4096 }
  0x1a   : > { %v286_v8 = vld [vmem:[%s1753_s23 + $0x28] sm:$0xff]  ;;  %v287_v11 = vld [vmem:[%s1753_s23 + $0x30] sm:$0xff]  ;;  %v289_v15 = vld [vmem:[%s1753_s23 + $0x40] sm:$0xff]  ;;  %1306 = vmatprep.subr.bf16.mxu0 %v1443_v12  ;;  %1353 = vmatpush3.bf16.msra.mxu1 %v1450_v43  ;;  %p1585_p11 = scmp.ne.s32.totalorder %s2014_s20, %s1584_s8 }
  0x1b   : > { %v290_v14 = vld [vmem:[%s1753_s23 + $0x48] sm:$0xff]  ;;  %v292_v17 = vld [vmem:[%s1753_s23 + $0x58] sm:$0xff]  ;;  %v291_v18 = vld [vmem:[%s1753_s23 + $0x50] sm:$0xff] }
  0x1c   : > { %1307 = vmatpush3.bf16.msra.mxu0 %v1443_v12  ;;  %v294_v20 = vld [vmem:[%s1753_s23 + $0x68] sm:$0xff]  ;;  %v293_v21 = vld [vmem:[%s1753_s23 + $0x60] sm:$0xff]  ;;  %v296_v23 = vld [vmem:[%s1753_s23 + $0x78] sm:$0xff]  ;;  %p1586_p12 = pnand %p1585_p11, %p1730_p5 }
  0x1d   : > { %331 = vperm.xlu1 %1439, %v284_v6   ;;  %321 = vperm.xlu0 %1438, %v282_v7   ;;  %v295_v24 = vld [vmem:[%s1753_s23 + $0x70] sm:$0xff]  ;;  %v298_v25 = vld [vmem:[%s1753_s23 + $0x88] sm:$0xff]  ;;  %v297_v26 = vld [vmem:[%s1753_s23 + $0x80] sm:$0xff] }
  0x1e   : > { %1308 = vmatprep.subr.bf16.mxu0 %v1444_v13  ;;  %v300_v27 = vld [vmem:[%s1753_s23 + $0x98] sm:$0xff]  ;;  %v299_v28 = vld [vmem:[%s1753_s23 + $0x90] sm:$0xff]  ;;  %v302_v29 = vld [vmem:[%s1753_s23 + $0xa8] sm:$0xff]  ;;  %p1587_p13 = pneg %p1586_p12 }
  0x1f   : > { %v301_v30 = vld [vmem:[%s1753_s23 + $0xa0] sm:$0xff]  ;;  %v304_v31 = vld [vmem:[%s1753_s23 + $0xb8] sm:$0xff]  ;;  %v303_v32 = vld [vmem:[%s1753_s23 + $0xb0] sm:$0xff] }
  0x20   : > { %1309 = vmatpush3.bf16.msra.mxu0 %v1444_v13  ;;  %v306_v33 = vld [vmem:[%s1753_s23 + $0xc8] sm:$0xff]  ;;  %v305_v34 = vld [vmem:[%s1753_s23 + $0xc0] sm:$0xff]  ;;  %v308_v35 = vld [vmem:[%s1753_s23 + $0xd8] sm:$0xff] }
  0x21   : > { %341 = vperm.xlu1 %1439, %v286_v8   ;;  %336 = vperm.xlu0 %1438, %v285_v9   ;;  %v307_v36 = vld [vmem:[%s1753_s23 + $0xd0] sm:$0xff]  ;;  %v310_v37 = vld [vmem:[%s1753_s23 + $0xe8] sm:$0xff]  ;;  %v309_v38 = vld [vmem:[%s1753_s23 + $0xe0] sm:$0xff] }
  0x22   : > { %1310 = vmatprep.subr.bf16.mxu0 %v1445_v16  ;;  %v312_v39 = vld [vmem:[%s1753_s23 + $0xf8] sm:$0xff]  ;;  %v311_v40 = vld [vmem:[%s1753_s23 + $0xf0] sm:$0xff]  ;;  %s1588_s23 = sshll.u32 %s1649_s9, 4  ;;  %s1589_s23 = int_to_ptr.vmem [resolvable:$false] %s1588_s23 }
  0x23   : > { %s1590_s13 = scalar_lea.vmem %s1589_s23, 8192  ;;  %p1591_p0 = scmp.lt.s32.totalorder %s2014_s20, %s1589_s23 }
  0x24   : > { %1311 = vmatpush3.bf16.msra.mxu0 %v1445_v16  ;;  %p1592_p1 = scmp.lt.s32.totalorder %s1590_s13, %s1584_s8 }
  0x25   : > { %351 = vperm.xlu1 %1439, %v288_v10   ;;  %346 = vperm.xlu0 %1438, %v287_v11  }
  0x26   : > { %1312 = vmatprep.subr.bf16.mxu0 %v1446_v19  ;;  %p1593_p2 = por %p1592_p1, %p1591_p0 }
  0x28   : > { %1313 = vmatpush3.bf16.msra.mxu0 %v1446_v19  ;;  %p1594_p3 = pnand %p1593_p2, %p1587_p13 }
  0x29   : > { %361 = vperm.xlu1 %1439, %v290_v14   ;;  %356 = vperm.xlu0 %1438, %v289_v15  }
  0x2a   : > { %1314 = vmatprep.subr.bf16.mxu0 %v1447_v22 }
  0x2c   : > { %1315 = vmatpush3.bf16.msra.mxu0 %v1447_v22 }
  0x2d   : > { %371 = vperm.xlu1 %1439, %v292_v17   ;;  %366 = vperm.xlu0 %1438, %v291_v18  }
  0x31   : > { %381 = vperm.xlu1 %1439, %v294_v20   ;;  %376 = vperm.xlu0 %1438, %v293_v21  }
  0x35   : > { %391 = vperm.xlu1 %1439, %v296_v23   ;;  %386 = vperm.xlu0 %1438, %v295_v24  }
  0x39   : > { %401 = vperm.xlu1 %1439, %v298_v25   ;;  %396 = vperm.xlu0 %1438, %v297_v26  }
  0x3d   : > { %411 = vperm.xlu1 %1439, %v300_v27   ;;  %406 = vperm.xlu0 %1438, %v299_v28  }
  0x41   : > { %421 = vperm.xlu1 %1439, %v302_v29   ;;  %416 = vperm.xlu0 %1438, %v301_v30  }
  0x45   : > { %431 = vperm.xlu1 %1439, %v304_v31   ;;  %426 = vperm.xlu0 %1438, %v303_v32  }
  0x49   : > { %441 = vperm.xlu1 %1439, %v306_v33   ;;  %436 = vperm.xlu0 %1438, %v305_v34  }
  0x4d   : > { %451 = vperm.xlu1 %1439, %v308_v35   ;;  %446 = vperm.xlu0 %1438, %v307_v36  }
  0x51   : > { %461 = vperm.xlu1 %1439, %v310_v37   ;;  %456 = vperm.xlu0 %1438, %v309_v38  }
  0x55   : > { %471 = vperm.xlu1 %1439, %v312_v39   ;;  %466 = vperm.xlu0 %1438, %v311_v40  }
  0x98   : > { %v327_v46 = vpop.permute.xlu1 %326  ;;  %v317_v47 = vpop.permute.xlu0 %316 }
  0x99   : > { %v482_v48 = vmul.f32 %v1814_v44, %v327_v46  ;;  %v480_v49 = vmul.f32 %v1814_v44, %v317_v47 }
  0x9b   : > { %v521_v50 = vadd.f32 %v1819_v45, %v482_v48  ;;  %v519_v51 = vadd.f32 %v1819_v45, %v480_v49 }
  0x9c   : > { %v332_v52 = vpop.permute.xlu1 %331  ;;  %v322_v53 = vpop.permute.xlu0 %321 }
  0x9d   : > { %v483_v54 = vmul.f32 %v1814_v44, %v332_v52  ;;  %v481_v55 = vmul.f32 %v1814_v44, %v322_v53  ;;  %1456 = vtanh.f32 %v521_v50 }
  0x9e   : > { %1458 = vtanh.f32 %v519_v51 }
  0x9f   : > { %v522_v56 = vadd.f32 %v1819_v45, %v483_v54  ;;  %v520_v57 = vadd.f32 %v1819_v45, %v481_v55 }
  0xa0   : > { %v342_v58 = vpop.permute.xlu1 %341  ;;  %v337_v59 = vpop.permute.xlu0 %336 }
  0xa1   : > { %1460 = vtanh.f32 %v522_v56  ;;  %v485_v60 = vmul.f32 %v1814_v44, %v342_v58  ;;  %v484_v61 = vmul.f32 %v1814_v44, %v337_v59 }
  0xa2   : > { %1462 = vtanh.f32 %v520_v57 }
  0xa3   : > { %v524_v62 = vadd.f32 %v1819_v45, %v485_v60  ;;  %v523_v63 = vadd.f32 %v1819_v45, %v484_v61 }
  0xa4   : > { %v352_v0 = vpop.permute.xlu1 %351  ;;  %v347_v1 = vpop.permute.xlu0 %346 }
  0xa5   : > { %1464 = vtanh.f32 %v524_v62  ;;  %v487_v2 = vmul.f32 %v1814_v44, %v352_v0  ;;  %v486_v3 = vmul.f32 %v1814_v44, %v347_v1 }
  0xa6   : > { %1466 = vtanh.f32 %v523_v63 }
  0xa7   : > { %v526_v4 = vadd.f32 %v1819_v45, %v487_v2  ;;  %v525_v5 = vadd.f32 %v1819_v45, %v486_v3  ;;  %v1457_v8 = vpop.eup %1456 }
  0xa8   : > { %v362_v6 = vpop.permute.xlu1 %361  ;;  %v357_v7 = vpop.permute.xlu0 %356 }
  0xa9   : > { %1468 = vtanh.f32 %v526_v4  ;;  %v489_v9 = vmul.f32 %v1814_v44, %v362_v6  ;;  %v488_v10 = vmul.f32 %v1814_v44, %v357_v7  ;;  %v1459_v11 = vpop.eup %1458 }
  0xaa   : > { %1470 = vtanh.f32 %v525_v5 }
  0xab   : > { %v1461_v12 = vpop.eup %1460  ;;  %v528_v13 = vadd.f32 %v1819_v45, %v489_v9  ;;  %v527_v14 = vadd.f32 %v1819_v45, %v488_v10 }
  0xac   : > { %v1463_v15 = vpop.eup %1462  ;;  %v372_v16 = vpop.permute.xlu1 %371  ;;  %v584_v18 = vpack.c.bf16 %v1461_v12, %v1457_v8 }
  0xad   : > { %v367_v17 = vpop.permute.xlu0 %366  ;;  %1472 = vtanh.f32 %v528_v13  ;;  %v491_v19 = vmul.f32 %v1814_v44, %v372_v16  ;;  %v583_v21 = vpack.c.bf16 %v1463_v15, %v1459_v11 }
  0xae   : > { %v490_v20 = vmul.f32 %v1814_v44, %v367_v17  ;;  %1474 = vtanh.f32 %v527_v14 }
  0xaf   : > { %v1465_v22 = vpop.eup %1464  ;;  %v530_v23 = vadd.f32 %v1819_v45, %v491_v19  ;;  %1316 = vmatprep.mubr.bf16.mxu0 %v583_v21 }
  0xb0   : > { %v529_v24 = vadd.f32 %v1819_v45, %v490_v20  ;;  %v1467_v25 = vpop.eup %1466  ;;  %1317 = vmatmul.mubr.bf16.vlgmr.msra.gmra.mrb[0].mxu0 %v584_v18  ;;  %v382_v26 = vpop.permute.xlu1 %381 }
  0xb1   : > { %v377_v27 = vpop.permute.xlu0 %376  ;;  %1476 = vtanh.f32 %v530_v23  ;;  %v493_v28 = vmul.f32 %v1814_v44, %v382_v26  ;;  %v585_v30 = vpack.c.bf16 %v1465_v22, %v1467_v25 }
  0xb2   : > { %v492_v29 = vmul.f32 %v1814_v44, %v377_v27  ;;  %1478 = vtanh.f32 %v529_v24 }
  0xb3   : > { %v1469_v31 = vpop.eup %1468  ;;  %v532_v32 = vadd.f32 %v1819_v45, %v493_v28  ;;  %1320 = vmatprep.mubr.bf16.mxu0 %v585_v30 }
  0xb4   : > { %v531_v33 = vadd.f32 %v1819_v45, %v492_v29  ;;  %v1471_v34 = vpop.eup %1470  ;;  %v392_v35 = vpop.permute.xlu1 %391 }
  0xb5   : > { %v387_v36 = vpop.permute.xlu0 %386  ;;  %1480 = vtanh.f32 %v532_v32  ;;  %v495_v37 = vmul.f32 %v1814_v44, %v392_v35  ;;  %v586_v39 = vpack.c.bf16 %v1469_v31, %v1471_v34 }
  0xb6   : > { %v494_v38 = vmul.f32 %v1814_v44, %v387_v36  ;;  %1482 = vtanh.f32 %v531_v33 }
  0xb7   : > { %v1473_v40 = vpop.eup %1472  ;;  %v534_v41 = vadd.f32 %v1819_v45, %v495_v37 }
  0xb8   : > { %v533_v42 = vadd.f32 %v1819_v45, %v494_v38  ;;  %v1475_v43 = vpop.eup %1474  ;;  %1321 = vmatmul.mubr.bf16.gmra.mrb[4].mxu0 %v586_v39  ;;  %v402_v46 = vpop.permute.xlu1 %401 }
  0xb9   : > { %v397_v47 = vpop.permute.xlu0 %396  ;;  %1484 = vtanh.f32 %v534_v41  ;;  %v497_v48 = vmul.f32 %v1814_v44, %v402_v46  ;;  %v587_v50 = vpack.c.bf16 %v1473_v40, %v1475_v43 }
  0xba   : > { %v496_v49 = vmul.f32 %v1814_v44, %v397_v47  ;;  %1486 = vtanh.f32 %v533_v42 }
  0xbb   : > { %v1477_v51 = vpop.eup %1476  ;;  %v536_v52 = vadd.f32 %v1819_v45, %v497_v48  ;;  %1324 = vmatprep.mubr.bf16.mxu0 %v587_v50 }
  0xbc   : > { %v535_v53 = vadd.f32 %v1819_v45, %v496_v49  ;;  %v1479_v54 = vpop.eup %1478  ;;  %v412_v55 = vpop.permute.xlu1 %411 }
  0xbd   : > { %v407_v56 = vpop.permute.xlu0 %406  ;;  %1488 = vtanh.f32 %v536_v52  ;;  %v499_v57 = vmul.f32 %v1814_v44, %v412_v55  ;;  %v588_v59 = vpack.c.bf16 %v1477_v51, %v1479_v54 }
  0xbe   : > { %v498_v58 = vmul.f32 %v1814_v44, %v407_v56  ;;  %1490 = vtanh.f32 %v535_v53 }
  0xbf   : > { %v1481_v60 = vpop.eup %1480  ;;  %v538_v61 = vadd.f32 %v1819_v45, %v499_v57 }
  0xc0   : > { %v537_v62 = vadd.f32 %v1819_v45, %v498_v58  ;;  %v1483_v63 = vpop.eup %1482  ;;  %1325 = vmatmul.mubr.bf16.gmra.mrb[8].mxu0 %v588_v59  ;;  %v422_v0 = vpop.permute.xlu1 %421 }
  0xc1   : > { %v417_v1 = vpop.permute.xlu0 %416  ;;  %1492 = vtanh.f32 %v538_v61  ;;  %v501_v2 = vmul.f32 %v1814_v44, %v422_v0  ;;  %v589_v4 = vpack.c.bf16 %v1481_v60, %v1483_v63 }
  0xc2   : > { %v500_v3 = vmul.f32 %v1814_v44, %v417_v1  ;;  %1494 = vtanh.f32 %v537_v62  ;;  %v1452_v1 = vld [vmem:[%s2068_s5 + $0x20] sm:$0xff]  }
  0xc3   : > { %v1485_v5 = vpop.eup %1484  ;;  %v540_v6 = vadd.f32 %v1819_v45, %v501_v2  ;;  %1328 = vmatprep.mubr.bf16.mxu0 %v589_v4  ;;  %v1453_v2 = vld [vmem:[%s2068_s5 + $0x28] sm:$0xff]   ;;  %v1455_v4 = vld [vmem:[%s2068_s5 + $0x38] sm:$0xff]  }
  0xc4   : > { %v539_v7 = vadd.f32 %v1819_v45, %v500_v3  ;;  %v1487_v8 = vpop.eup %1486  ;;  %v432_v9 = vpop.permute.xlu1 %431  ;;  %v1454_v3 = vld [vmem:[%s2068_s5 + $0x30] sm:$0xff]  }
  0xc5   : > { %v427_v10 = vpop.permute.xlu0 %426  ;;  %1496 = vtanh.f32 %v540_v6  ;;  %v503_v11 = vmul.f32 %v1814_v44, %v432_v9  ;;  %v590_v13 = vpack.c.bf16 %v1485_v5, %v1487_v8  ;;  %v1903_v5 = vld [vmem:[%s2067_s4] ss:$0 sm:$0xff] }
  0xc6   : > { %v502_v12 = vmul.f32 %v1814_v44, %v427_v10  ;;  %1498 = vtanh.f32 %v539_v7 }
  0xc7   : > { %v1489_v14 = vpop.eup %1488  ;;  %v542_v15 = vadd.f32 %v1819_v45, %v503_v11 }
  0xc8   : > { %v541_v16 = vadd.f32 %v1819_v45, %v502_v12  ;;  %v1491_v17 = vpop.eup %1490  ;;  %1329 = vmatmul.mubr.bf16.gmra.mrb[12].mxu0 %v590_v13  ;;  %v442_v18 = vpop.permute.xlu1 %441 }
  0xc9   : > { %v437_v19 = vpop.permute.xlu0 %436  ;;  %1500 = vtanh.f32 %v542_v15  ;;  %v505_v20 = vmul.f32 %v1814_v44, %v442_v18  ;;  %v591_v22 = vpack.c.bf16 %v1489_v14, %v1491_v17 }
  0xca   : > { %v504_v21 = vmul.f32 %v1814_v44, %v437_v19  ;;  %1502 = vtanh.f32 %v541_v16 }
  0xcb   : > { %v1493_v23 = vpop.eup %1492  ;;  %v544_v24 = vadd.f32 %v1819_v45, %v505_v20  ;;  %1332 = vmatprep.mubr.bf16.mxu0 %v591_v22 }
  0xcc   : > { %v543_v25 = vadd.f32 %v1819_v45, %v504_v21  ;;  %v1495_v26 = vpop.eup %1494  ;;  %v452_v27 = vpop.permute.xlu1 %451 }
  0xcd   : > { %v447_v28 = vpop.permute.xlu0 %446  ;;  %1504 = vtanh.f32 %v544_v24  ;;  %v507_v29 = vmul.f32 %v1814_v44, %v452_v27  ;;  %v592_v31 = vpack.c.bf16 %v1493_v23, %v1495_v26 }
  0xce   : > { %v506_v30 = vmul.f32 %v1814_v44, %v447_v28  ;;  %1506 = vtanh.f32 %v543_v25 }
  0xcf   : > { %v1497_v32 = vpop.eup %1496  ;;  %v546_v33 = vadd.f32 %v1819_v45, %v507_v29 }
  0xd0   : > { %v545_v34 = vadd.f32 %v1819_v45, %v506_v30  ;;  %v1499_v35 = vpop.eup %1498  ;;  %1333 = vmatmul.mubr.bf16.gmra.mrb[16].mxu0 %v592_v31  ;;  %v462_v36 = vpop.permute.xlu1 %461 }
  0xd1   : > { %v457_v37 = vpop.permute.xlu0 %456  ;;  %1508 = vtanh.f32 %v546_v33  ;;  %v509_v38 = vmul.f32 %v1814_v44, %v462_v36  ;;  %v593_v40 = vpack.c.bf16 %v1497_v32, %v1499_v35 }
  0xd2   : > { %v508_v39 = vmul.f32 %v1814_v44, %v457_v37  ;;  %1510 = vtanh.f32 %v545_v34 }
  0xd3   : > { %v1501_v41 = vpop.eup %1500  ;;  %v548_v42 = vadd.f32 %v1819_v45, %v509_v38  ;;  %1336 = vmatprep.mubr.bf16.mxu0 %v593_v40 }
  0xd4   : > { %v547_v43 = vadd.f32 %v1819_v45, %v508_v39  ;;  %v1503_v46 = vpop.eup %1502  ;;  %v472_v47 = vpop.permute.xlu1 %471 }
  0xd5   : > { %v467_v48 = vpop.permute.xlu0 %466  ;;  %1512 = vtanh.f32 %v548_v42  ;;  %v511_v49 = vmul.f32 %v1814_v44, %v472_v47  ;;  %v594_v51 = vpack.c.bf16 %v1501_v41, %v1503_v46 }
  0xd6   : > { %v510_v50 = vmul.f32 %v1814_v44, %v467_v48  ;;  %1514 = vtanh.f32 %v547_v43 }
  0xd7   : > { %v1505_v52 = vpop.eup %1504  ;;  %v550_v53 = vadd.f32 %v1819_v45, %v511_v49 }
  0xd8   : > { %v549_v54 = vadd.f32 %v1819_v45, %v510_v50  ;;  %v1507_v55 = vpop.eup %1506  ;;  %1337 = vmatmul.mubr.bf16.gmra.mrb[20].mxu0 %v594_v51  ;;  %v1451_v45 = vld [vmem:[%s2068_s5 + $0x18] sm:$0xff]  }
  0xd9   : > { %1516 = vtanh.f32 %v550_v53  ;;  %v595_v56 = vpack.c.bf16 %v1505_v52, %v1507_v55  ;;  %1354 = vmatprep.subr.bf16.mxu1 %v1451_v45 }
  0xda   : > { %1518 = vtanh.f32 %v549_v54  ;;  %1355 = vmatpush3.bf16.msra.mxu1 %v1451_v45 }
  0xdb   : > { %v1509_v57 = vpop.eup %1508  ;;  %1340 = vmatprep.mubr.bf16.mxu0 %v595_v56  ;;  %1356 = vmatprep.subr.bf16.mxu1 %v1452_v1 }
  0xdc   : > { %v1511_v58 = vpop.eup %1510 }
  0xdd   : > { %v596_v59 = vpack.c.bf16 %v1509_v57, %v1511_v58 }
  0xde   : > { %1357 = vmatpush3.bf16.msra.mxu1 %v1452_v1 }
  0xdf   : > { %v1513_v60 = vpop.eup %1512  ;;  %1358 = vmatprep.subr.bf16.mxu1 %v1453_v2 }
  0xe0   : > { %v1515_v61 = vpop.eup %1514  ;;  %1341 = vmatmul.mubr.bf16.gmra.mrb[24].mxu0 %v596_v59 }
  0xe1   : > { %v597_v44 = vpack.c.bf16 %v1513_v60, %v1515_v61 }
  0xe2   : > { %1359 = vmatpush3.bf16.msra.mxu1 %v1453_v2 }
  0xe3   : > { %v1517_v62 = vpop.eup %1516  ;;  %1344 = vmatprep.mubr.bf16.mxu0 %v597_v44  ;;  %1360 = vmatprep.subr.bf16.mxu1 %v1454_v3 }
  0xe4   : > { %v1519_v63 = vpop.eup %1518 }
  0xe5   : > { %v598_v0 = vpack.c.bf16 %v1517_v62, %v1519_v63 }
  0xe6   : > { %1361 = vmatpush3.bf16.msra.mxu1 %v1454_v3 }
  0xe7   : > { %1362 = vmatprep.subr.bf16.mxu1 %v1455_v4 }
  0xe8   : > { %1345 = vmatmul.mubr.bf16.gmra.mrb[28].mxu0 %v598_v0 }
  0xea   : > { %1363 = vmatpush3.bf16.msra.mxu1 %v1455_v4 }
 0x183   : > { %v1318_v6 = vpop.f32.mrb[0].mxu0 }
 0x184   : > { %v713_v7 = vadd.f32 %v1318_v6, %v1903_v5  ;;  %v704_v8 = vpop.f32.mrb[1].mxu0 }
 0x185   : > { %v705_v9 = vadd.f32 %v1903_v5, %v704_v8  ;;  %v1319_v10 = vpop.f32.mrb[2].mxu0 }
 0x186   : > { %1520 = vtanh.f32 %v713_v7  ;;  %v716_v11 = vadd.f32 %v1319_v10, %v1903_v5  ;;  %v707_v12 = vpop.f32.mrb[3].mxu0 }
 0x187   : > { %1522 = vtanh.f32 %v705_v9  ;;  %v708_v13 = vadd.f32 %v1903_v5, %v707_v12 }
 0x188   : > { %1524 = vtanh.f32 %v716_v11 }
 0x189   : > { %1526 = vtanh.f32 %v708_v13 }
 0x18b   : > { %v1322_v14 = vpop.f32.mrb[4].mxu0 }
 0x18c   : > { %v729_v15 = vadd.f32 %v1322_v14, %v1903_v5  ;;  %v720_v16 = vpop.f32.mrb[5].mxu0 }
 0x18d   : > { %v721_v17 = vadd.f32 %v1903_v5, %v720_v16  ;;  %v1323_v18 = vpop.f32.mrb[6].mxu0 }
 0x18e   : > { %1528 = vtanh.f32 %v729_v15  ;;  %v732_v19 = vadd.f32 %v1323_v18, %v1903_v5  ;;  %v723_v20 = vpop.f32.mrb[7].mxu0 }
 0x18f   : > { %1530 = vtanh.f32 %v721_v17  ;;  %v724_v21 = vadd.f32 %v1903_v5, %v723_v20 }
 0x190   : > { %v1521_v22 = vpop.eup %1520  ;;  %1532 = vtanh.f32 %v732_v19 }
 0x191   : > { %v1523_v23 = vpop.eup %1522  ;;  %1534 = vtanh.f32 %v724_v21 }
 0x192   : > { %v1525_v24 = vpop.eup %1524 }
 0x193   : > { %v1527_v25 = vpop.eup %1526  ;;  %v1326_v26 = vpop.f32.mrb[8].mxu0  ;;  %v864_v27 = vpack.c.bf16 %v1525_v24, %v1521_v22 }
 0x194   : > { %v745_v28 = vadd.f32 %v1326_v26, %v1903_v5  ;;  %v736_v29 = vpop.f32.mrb[9].mxu0  ;;  %v863_v30 = vpack.c.bf16 %v1527_v25, %v1523_v23 }
 0x195   : > { %v737_v31 = vadd.f32 %v1903_v5, %v736_v29  ;;  %v1327_v32 = vpop.f32.mrb[10].mxu0 }
 0x196   : > { %1536 = vtanh.f32 %v745_v28  ;;  %v748_v33 = vadd.f32 %v1327_v32, %v1903_v5  ;;  %v739_v34 = vpop.f32.mrb[11].mxu0  ;;  %1364 = vmatprep.mubr.bf16.mxu1 %v863_v30 }
 0x197   : > { %1538 = vtanh.f32 %v737_v31  ;;  %v740_v35 = vadd.f32 %v1903_v5, %v739_v34  ;;  %1365 = vmatmul.mubr.bf16.vlgmr.msra.gmra.mrb[0].mxu1 %v864_v27 }
 0x198   : > { %v1529_v36 = vpop.eup %1528  ;;  %1540 = vtanh.f32 %v748_v33 }
 0x199   : > { %v1531_v37 = vpop.eup %1530  ;;  %1542 = vtanh.f32 %v740_v35 }
 0x19a   : > { %v1533_v38 = vpop.eup %1532 }
 0x19b   : > { %v1535_v39 = vpop.eup %1534  ;;  %v1330_v40 = vpop.f32.mrb[12].mxu0  ;;  %v866_v41 = vpack.c.bf16 %v1533_v38, %v1529_v36 }
 0x19c   : > { %v761_v42 = vadd.f32 %v1330_v40, %v1903_v5  ;;  %v752_v43 = vpop.f32.mrb[13].mxu0  ;;  %v865_v46 = vpack.c.bf16 %v1535_v39, %v1531_v37 }
 0x19d   : > { %v753_v47 = vadd.f32 %v1903_v5, %v752_v43  ;;  %v1331_v48 = vpop.f32.mrb[14].mxu0 }
 0x19e   : > { %1544 = vtanh.f32 %v761_v42  ;;  %v764_v49 = vadd.f32 %v1331_v48, %v1903_v5  ;;  %v755_v50 = vpop.f32.mrb[15].mxu0  ;;  %1368 = vmatprep.mubr.bf16.mxu1 %v865_v46 }
 0x19f   : > { %1546 = vtanh.f32 %v753_v47  ;;  %v756_v51 = vadd.f32 %v1903_v5, %v755_v50  ;;  %1369 = vmatmul.mubr.bf16.gmra.mrb[4].mxu1 %v866_v41 }
 0x1a0   : > { %v1537_v52 = vpop.eup %1536  ;;  %1548 = vtanh.f32 %v764_v49 }
 0x1a1   : > { %v1539_v53 = vpop.eup %1538  ;;  %1550 = vtanh.f32 %v756_v51 }
 0x1a2   : > { %v1541_v54 = vpop.eup %1540 }
 0x1a3   : > { %v1543_v55 = vpop.eup %1542  ;;  %v1334_v56 = vpop.f32.mrb[16].mxu0  ;;  %v868_v57 = vpack.c.bf16 %v1541_v54, %v1537_v52 }
 0x1a4   : > { %v777_v58 = vadd.f32 %v1334_v56, %v1903_v5  ;;  %v768_v59 = vpop.f32.mrb[17].mxu0  ;;  %v867_v60 = vpack.c.bf16 %v1543_v55, %v1539_v53 }
 0x1a5   : > { %v769_v61 = vadd.f32 %v1903_v5, %v768_v59  ;;  %v1335_v44 = vpop.f32.mrb[18].mxu0 }
 0x1a6   : > { %1552 = vtanh.f32 %v777_v58  ;;  %v780_v62 = vadd.f32 %v1335_v44, %v1903_v5  ;;  %v771_v63 = vpop.f32.mrb[19].mxu0  ;;  %1372 = vmatprep.mubr.bf16.mxu1 %v867_v60 }
 0x1a7   : > { %1554 = vtanh.f32 %v769_v61  ;;  %v772_v0 = vadd.f32 %v1903_v5, %v771_v63  ;;  %1373 = vmatmul.mubr.bf16.gmra.mrb[8].mxu1 %v868_v57 }
 0x1a8   : > { %v1545_v45 = vpop.eup %1544  ;;  %1556 = vtanh.f32 %v780_v62 }
 0x1a9   : > { %v1547_v1 = vpop.eup %1546  ;;  %1558 = vtanh.f32 %v772_v0 }
 0x1aa   : > { %v1549_v2 = vpop.eup %1548 }
 0x1ab   : > { %v1551_v3 = vpop.eup %1550  ;;  %v1338_v4 = vpop.f32.mrb[20].mxu0  ;;  %v870_v6 = vpack.c.bf16 %v1549_v2, %v1545_v45 }
 0x1ac   : > { %v793_v7 = vadd.f32 %v1338_v4, %v1903_v5  ;;  %v784_v8 = vpop.f32.mrb[21].mxu0  ;;  %v869_v9 = vpack.c.bf16 %v1551_v3, %v1547_v1 }
 0x1ad   : > { %v785_v10 = vadd.f32 %v1903_v5, %v784_v8  ;;  %v1339_v11 = vpop.f32.mrb[22].mxu0 }
 0x1ae   : > { %1560 = vtanh.f32 %v793_v7  ;;  %v796_v12 = vadd.f32 %v1339_v11, %v1903_v5  ;;  %v787_v13 = vpop.f32.mrb[23].mxu0  ;;  %1376 = vmatprep.mubr.bf16.mxu1 %v869_v9 }
 0x1af   : > { %1562 = vtanh.f32 %v785_v10  ;;  %v788_v14 = vadd.f32 %v1903_v5, %v787_v13  ;;  %1377 = vmatmul.mubr.bf16.gmra.mrb[12].mxu1 %v870_v6 }
 0x1b0   : > { %v1553_v15 = vpop.eup %1552  ;;  %1564 = vtanh.f32 %v796_v12 }
 0x1b1   : > { %v1555_v16 = vpop.eup %1554  ;;  %1566 = vtanh.f32 %v788_v14 }
 0x1b2   : > { %v1557_v17 = vpop.eup %1556 }
 0x1b3   : > { %v1559_v18 = vpop.eup %1558  ;;  %v1342_v19 = vpop.f32.mrb[24].mxu0  ;;  %v872_v20 = vpack.c.bf16 %v1557_v17, %v1553_v15 }
 0x1b4   : > { %v809_v21 = vadd.f32 %v1342_v19, %v1903_v5  ;;  %v800_v22 = vpop.f32.mrb[25].mxu0  ;;  %v871_v23 = vpack.c.bf16 %v1559_v18, %v1555_v16 }
 0x1b5   : > { %v801_v24 = vadd.f32 %v1903_v5, %v800_v22  ;;  %v1343_v25 = vpop.f32.mrb[26].mxu0 }
 0x1b6   : > { %1568 = vtanh.f32 %v809_v21  ;;  %v812_v26 = vadd.f32 %v1343_v25, %v1903_v5  ;;  %v803_v27 = vpop.f32.mrb[27].mxu0  ;;  %1380 = vmatprep.mubr.bf16.mxu1 %v871_v23 }
 0x1b7   : > { %1570 = vtanh.f32 %v801_v24  ;;  %v804_v28 = vadd.f32 %v1903_v5, %v803_v27  ;;  %1381 = vmatmul.mubr.bf16.gmra.mrb[16].mxu1 %v872_v20 }
 0x1b8   : > { %v1561_v29 = vpop.eup %1560  ;;  %1572 = vtanh.f32 %v812_v26 }
 0x1b9   : > { %v1563_v30 = vpop.eup %1562  ;;  %1574 = vtanh.f32 %v804_v28 }
 0x1ba   : > { %v1565_v31 = vpop.eup %1564 }
 0x1bb   : > { %v1567_v32 = vpop.eup %1566  ;;  %v1346_v33 = vpop.f32.mrb[28].mxu0  ;;  %v874_v34 = vpack.c.bf16 %v1565_v31, %v1561_v29 }
 0x1bc   : > { %v825_v35 = vadd.f32 %v1346_v33, %v1903_v5  ;;  %v816_v36 = vpop.f32.mrb[29].mxu0  ;;  %v873_v37 = vpack.c.bf16 %v1567_v32, %v1563_v30 }
 0x1bd   : > { %v817_v38 = vadd.f32 %v1903_v5, %v816_v36  ;;  %v1347_v39 = vpop.f32.mrb[30].mxu0 }
 0x1be   : > { %1576 = vtanh.f32 %v825_v35  ;;  %v828_v40 = vadd.f32 %v1347_v39, %v1903_v5  ;;  %v819_v41 = vpop.f32.mrb[31].mxu0  ;;  %1384 = vmatprep.mubr.bf16.mxu1 %v873_v37 }
 0x1bf   : > { %1578 = vtanh.f32 %v817_v38  ;;  %v820_v42 = vadd.f32 %v1903_v5, %v819_v41  ;;  %1385 = vmatmul.mubr.bf16.gmra.mrb[20].mxu1 %v874_v34  ;;  %v1943_v5 = vld [vmem:[%s2069_s6] ss:$0 sm:$0xff] }
 0x1c0   : > { %v1569_v43 = vpop.eup %1568  ;;  %1580 = vtanh.f32 %v828_v40 }
 0x1c1   : > { %v1571_v46 = vpop.eup %1570  ;;  %1582 = vtanh.f32 %v820_v42 }
 0x1c2   : > { %v1573_v47 = vpop.eup %1572 }
 0x1c3   : > { %v1575_v48 = vpop.eup %1574  ;;  %v876_v49 = vpack.c.bf16 %v1573_v47, %v1569_v43 }
 0x1c4   : > { %v875_v50 = vpack.c.bf16 %v1575_v48, %v1571_v46 }
 0x1c6   : > { %1388 = vmatprep.mubr.bf16.mxu1 %v875_v50 }
 0x1c7   : > { %1389 = vmatmul.mubr.bf16.gmra.mrb[24].mxu1 %v876_v49 }
 0x1c8   : > { %v1577_v51 = vpop.eup %1576 }
 0x1c9   : > { %v1579_v52 = vpop.eup %1578 }
 0x1ca   : > { %v1581_v53 = vpop.eup %1580 }
 0x1cb   : > { %v1583_v54 = vpop.eup %1582  ;;  %v878_v55 = vpack.c.bf16 %v1581_v53, %v1577_v51 }
 0x1cc   : > { %v877_v56 = vpack.c.bf16 %v1583_v54, %v1579_v52 }
 0x1ce   : > { %1392 = vmatprep.mubr.bf16.mxu1 %v877_v56 }
 0x1cf   : > { %1393 = vmatmul.mubr.bf16.gmra.mrb[28].mxu1 %v878_v55 }
 0x26a   : > { %v1366_v57 = vpop.f32.mrb[0].mxu1 }
 0x26b   : > { %v993_v58 = vadd.f32 %v1366_v57, %v1943_v5  ;;  %v984_v59 = vpop.f32.mrb[1].mxu1 }
 0x26c   : > { %v985_v60 = vadd.f32 %v1943_v5, %v984_v59  ;;  %v1367_v61 = vpop.f32.mrb[2].mxu1 }
 0x26d   : > { %1113 = vst [vmem:[%s1947_s18 + $0x10] sm:$0xff] %v993_v58  ;;  %v996_v44 = vadd.f32 %v1367_v61, %v1943_v5  ;;  %v987_v62 = vpop.f32.mrb[3].mxu1 }
 0x26e   : > { %1111 = vst [vmem:[%s1947_s18] sm:$0xff] %v985_v60  ;;  %v988_v63 = vadd.f32 %v1943_v5, %v987_v62 }
 0x26f   : > { %1114 = vst [vmem:[%s1947_s18 + $0x18] sm:$0xff] %v996_v44 }
 0x270   : > { %1112 = vst [vmem:[%s1947_s18 + $0x8] sm:$0xff] %v988_v63 }
 0x272   : > { %v1370_v0 = vpop.f32.mrb[4].mxu1 }
 0x273   : > { %v1009_v45 = vadd.f32 %v1370_v0, %v1943_v5  ;;  %v1000_v1 = vpop.f32.mrb[5].mxu1 }
 0x274   : > { %v1001_v2 = vadd.f32 %v1943_v5, %v1000_v1  ;;  %v1371_v3 = vpop.f32.mrb[6].mxu1 }
 0x275   : > { %1117 = vst [vmem:[%s1947_s18 + $0x30] sm:$0xff] %v1009_v45  ;;  %v1012_v4 = vadd.f32 %v1371_v3, %v1943_v5  ;;  %v1003_v6 = vpop.f32.mrb[7].mxu1 }
 0x276   : > { %1115 = vst [vmem:[%s1947_s18 + $0x20] sm:$0xff] %v1001_v2  ;;  %v1004_v7 = vadd.f32 %v1943_v5, %v1003_v6 }
 0x277   : > { %1118 = vst [vmem:[%s1947_s18 + $0x38] sm:$0xff] %v1012_v4 }
 0x278   : > { %1116 = vst [vmem:[%s1947_s18 + $0x28] sm:$0xff] %v1004_v7 }
 0x27a   : > { %v1374_v8 = vpop.f32.mrb[8].mxu1 }
 0x27b   : > { %v1025_v9 = vadd.f32 %v1374_v8, %v1943_v5  ;;  %v1016_v10 = vpop.f32.mrb[9].mxu1 }
 0x27c   : > { %v1017_v11 = vadd.f32 %v1943_v5, %v1016_v10  ;;  %v1375_v12 = vpop.f32.mrb[10].mxu1 }
 0x27d   : > { %1121 = vst [vmem:[%s1947_s18 + $0x50] sm:$0xff] %v1025_v9  ;;  %v1028_v13 = vadd.f32 %v1375_v12, %v1943_v5  ;;  %v1019_v14 = vpop.f32.mrb[11].mxu1 }
 0x27e   : > { %1119 = vst [vmem:[%s1947_s18 + $0x40] sm:$0xff] %v1017_v11  ;;  %v1020_v15 = vadd.f32 %v1943_v5, %v1019_v14 }
 0x27f   : > { %1122 = vst [vmem:[%s1947_s18 + $0x58] sm:$0xff] %v1028_v13 }
 0x280   : > { %1120 = vst [vmem:[%s1947_s18 + $0x48] sm:$0xff] %v1020_v15 }
 0x282   : > { %v1378_v16 = vpop.f32.mrb[12].mxu1 }
 0x283   : > { %v1041_v17 = vadd.f32 %v1378_v16, %v1943_v5  ;;  %v1032_v18 = vpop.f32.mrb[13].mxu1 }
 0x284   : > { %v1033_v19 = vadd.f32 %v1943_v5, %v1032_v18  ;;  %v1379_v20 = vpop.f32.mrb[14].mxu1 }
 0x285   : > { %1125 = vst [vmem:[%s1947_s18 + $0x70] sm:$0xff] %v1041_v17  ;;  %v1044_v21 = vadd.f32 %v1379_v20, %v1943_v5  ;;  %v1035_v22 = vpop.f32.mrb[15].mxu1 }
 0x286   : > { %1123 = vst [vmem:[%s1947_s18 + $0x60] sm:$0xff] %v1033_v19  ;;  %v1036_v23 = vadd.f32 %v1943_v5, %v1035_v22 }
 0x287   : > { %1126 = vst [vmem:[%s1947_s18 + $0x78] sm:$0xff] %v1044_v21 }
 0x288   : > { %1124 = vst [vmem:[%s1947_s18 + $0x68] sm:$0xff] %v1036_v23 }
 0x28a   : > { %v1382_v24 = vpop.f32.mrb[16].mxu1 }
 0x28b   : > { %v1057_v25 = vadd.f32 %v1382_v24, %v1943_v5  ;;  %v1048_v26 = vpop.f32.mrb[17].mxu1 }
 0x28c   : > { %v1049_v27 = vadd.f32 %v1943_v5, %v1048_v26  ;;  %v1383_v28 = vpop.f32.mrb[18].mxu1 }
 0x28d   : > { %1129 = vst [vmem:[%s1947_s18 + $0x90] sm:$0xff] %v1057_v25  ;;  %v1060_v29 = vadd.f32 %v1383_v28, %v1943_v5  ;;  %v1051_v30 = vpop.f32.mrb[19].mxu1 }
 0x28e   : > { %1127 = vst [vmem:[%s1947_s18 + $0x80] sm:$0xff] %v1049_v27  ;;  %v1052_v31 = vadd.f32 %v1943_v5, %v1051_v30 }
 0x28f   : > { %1130 = vst [vmem:[%s1947_s18 + $0x98] sm:$0xff] %v1060_v29 }
 0x290   : > { %1128 = vst [vmem:[%s1947_s18 + $0x88] sm:$0xff] %v1052_v31 }
 0x292   : > { %v1386_v32 = vpop.f32.mrb[20].mxu1 }
 0x293   : > { %v1073_v33 = vadd.f32 %v1386_v32, %v1943_v5  ;;  %v1064_v34 = vpop.f32.mrb[21].mxu1 }
 0x294   : > { %v1065_v35 = vadd.f32 %v1943_v5, %v1064_v34  ;;  %v1387_v36 = vpop.f32.mrb[22].mxu1 }
 0x295   : > { %1133 = vst [vmem:[%s1947_s18 + $0xb0] sm:$0xff] %v1073_v33  ;;  %v1076_v37 = vadd.f32 %v1387_v36, %v1943_v5  ;;  %v1067_v38 = vpop.f32.mrb[23].mxu1 }
 0x296   : > { %1131 = vst [vmem:[%s1947_s18 + $0xa0] sm:$0xff] %v1065_v35  ;;  %v1068_v39 = vadd.f32 %v1943_v5, %v1067_v38 }
 0x297   : > { %1134 = vst [vmem:[%s1947_s18 + $0xb8] sm:$0xff] %v1076_v37 }
 0x298   : > { %1132 = vst [vmem:[%s1947_s18 + $0xa8] sm:$0xff] %v1068_v39 }
 0x29a   : > { %v1390_v40 = vpop.f32.mrb[24].mxu1 }
 0x29b   : > { %v1089_v41 = vadd.f32 %v1390_v40, %v1943_v5  ;;  %v1080_v42 = vpop.f32.mrb[25].mxu1 }
 0x29c   : > { %v1081_v43 = vadd.f32 %v1943_v5, %v1080_v42  ;;  %v1391_v46 = vpop.f32.mrb[26].mxu1 }
 0x29d   : > { %1137 = vst [vmem:[%s1947_s18 + $0xd0] sm:$0xff] %v1089_v41  ;;  %v1092_v47 = vadd.f32 %v1391_v46, %v1943_v5  ;;  %v1083_v48 = vpop.f32.mrb[27].mxu1 }
 0x29e   : > { %1135 = vst [vmem:[%s1947_s18 + $0xc0] sm:$0xff] %v1081_v43  ;;  %v1084_v49 = vadd.f32 %v1943_v5, %v1083_v48 }
 0x29f   : > { %1138 = vst [vmem:[%s1947_s18 + $0xd8] sm:$0xff] %v1092_v47 }
 0x2a0   : > { %1136 = vst [vmem:[%s1947_s18 + $0xc8] sm:$0xff] %v1084_v49 }
 0x2a2   : > { %v1394_v50 = vpop.f32.mrb[28].mxu1 }
 0x2a3   : > { %v1105_v51 = vadd.f32 %v1394_v50, %v1943_v5  ;;  %v1096_v52 = vpop.f32.mrb[29].mxu1 }
 0x2a4   : > { %v1097_v53 = vadd.f32 %v1943_v5, %v1096_v52  ;;  %v1395_v54 = vpop.f32.mrb[30].mxu1 }
 0x2a5   : > { %1141 = vst [vmem:[%s1947_s18 + $0xf0] sm:$0xff] %v1105_v51  ;;  %v1108_v55 = vadd.f32 %v1395_v54, %v1943_v5  ;;  %v1099_v56 = vpop.f32.mrb[31].mxu1 }
 0x2a6   : > { %1139 = vst [vmem:[%s1947_s18 + $0xe0] sm:$0xff] %v1097_v53  ;;  %v1100_v57 = vadd.f32 %v1943_v5, %v1099_v56 }
 0x2a7   : > { %1142 = vst [vmem:[%s1947_s18 + $0xf8] sm:$0xff] %v1108_v55 }
 0x2a8   : > { %1140 = vst [vmem:[%s1947_s18 + $0xe8] sm:$0xff] %v1100_v57 }
 0x2a9   : > { %1597 = shalt.err (!%p1594_p3)
}
 0x2aa   : > { %s1598_s14 = scalar_lea.hbm %s2012_s29, 4096  ;;  %s1602_s17 = scalar_lea.hbm %s2070_s7, 8192 }
 0x2ab   : > { %p1599_p4 = scmp.ne.s32.totalorder %s2012_s29, %s1598_s14  ;;  %p1603_p9 = scmp.lt.u32.totalorder %s2012_s29, %s2070_s7 }
 0x2ac   : > { %p1604_p10 = scmp.lt.u32.totalorder %s1602_s17, %s1598_s14  ;;  %p1606_p12 = scmp.lt.u32.totalorder %s1598_s14, %s2012_s29 }
 0x2ad   : > { %p1600_p7 = pnand %p1599_p4, %p1730_p5 }
 0x2ae   : > { %p1605_p11 = por %p1604_p10, %p1603_p9 }
 0x2af   : > { %p1601_p8 = pneg %p1600_p7 }
 0x2b0   : > { %p1607_p13 = por %p1606_p12, %p1605_p11 }
 0x2b2   : > { %p1608_p0 = pnand %p1607_p13, %p1601_p8 }
 0x2b4   : > { %1611 = shalt.err (!%p1608_p0)
}
 0x2b5   : > { %s1650_s21 = smov 128   ;;  %s1651_s22 = smov 8  }
 0x2b6   : > { %1396 = dma.vmem_to_hbm [thread:$0]  (%p1730_p5), %s2014_s20, 4096, %s2012_s29, %s2022_s28, %s1650_s21, %s1650_s21, %s1651_s22  }
 0x2b7 PF: > { %p1402_p1 = scmp.ge.s32.totalorder %s1646_s27, 2  ;;  %s1172_s8 = sand.u32 1, %s1634_s24  }
 0x2b8   : > { %s1173_s9 = scalar_lea.sflag [#allocation3], %s1172_s8 }
 0x2b9   : > { %p1399_p2 = pnand %p1402_p1, %p1734_p6 }
 0x2bb   : > { %1629 = dma.done.wait (!%p1399_p2), %s1173_s9, 4096  }
 0x2bc   : > { %1631 = vsyncadd (!%p1399_p2), %s1173_s9, 4294963200  ;;  %p17_p3 = scmp.ge.s32.totalorder %s1717_s30, 4   ;;  %s2073_s24 = smov %s1638_s25 }
 0x2bd   : > { %s2074_s25 = smov %s1642_s26  ;;  %s2075_s26 = smov %s1728_s10 }
 0x2be   : > { %s2076_s27 = smov %s1717_s30  ;;  %19 = sbr.rel (!%p17_p3) target bundleno = 3 (0x3), region = 83 }
 0x2c5   :  { %1178 = vsyncpa [#allocation3], 1 }
 0x2c6   :  { %1180 = vsyncpa [#allocation3 + $0x1], 1 }

</bundles_post_ra>
